<compile_context>
chip_gen: v7x
topology: tpu7x:2x2x1
jax: 0.10.0
libtpu: 0.0.40
codegen_flags: <defaults>
</compile_context>

<pallas_src>
import functools

import jax
import jax.numpy as jnp
from jax import lax
from jax.experimental import pallas as pl
from jax.experimental.pallas import tpu as pltpu

# ---------------- hyper-parameters (match PyTorch defaults) ----------------
NUM_STEPS = 1
STEP_SIZE = 1e-3
EPSILON = 1e-6
NOISE_VAR = 1e-5


def _round_up(x, m):
    return (x + m - 1) // m * m


def smart_loss_kernel(embed_ref, state_ref, w_ref, noise_ref, out_ref, acc_ref,
                      *, num_steps, step_size, epsilon, noise_var, inv_nc):
    # embed_ref/noise_ref: (TM, Hp) row tile; state_ref: (TM, Cp); w_ref: (Hp, Cp)
    # (resident across all grid steps).  inv_nc = 1 / (GLOBAL N * C).
    w = w_ref[...]                                     # native dtype -> MXU feed
    embed = embed_ref[...].astype(jnp.float32)
    state = state_ref[...].astype(jnp.float32)
    # noise = randn_like(embed) * noise_var
    noise = noise_ref[...].astype(jnp.float32) * noise_var

    # Contract the class dim of diff with the class dim of W directly
    # (== diff @ W^T without materializing a transposed copy of W).
    grad_dnums = (((1,), (1,)), ((), ()))

    # i = 0 .. num_steps-1 : projected "adversarial" gradient ascent on noise
    for _ in range(num_steps):
        embed_perturbed = embed + noise
        state_perturbed = jnp.dot(embed_perturbed.astype(w.dtype), w,
                                  preferred_element_type=jnp.float32)
        diff = state_perturbed - state                               # (TM, Cp)
        # analytic d(MSE)/d(noise) = (2/(N*C)) * diff @ W^T   (GLOBAL N*C)
        noise_grad = (2.0 * inv_nc) * lax.dot_general(
            diff.astype(w.dtype), w, dimension_numbers=grad_dnums,
            preferred_element_type=jnp.float32)                     # (TM, Hp)
        step = noise + step_size * noise_grad
        step_norm = jnp.max(jnp.abs(step), axis=-1, keepdims=True)  # inf-norm
        noise = step * pl.reciprocal(step_norm + epsilon, approx=False)

    # i == num_steps : loss_last_fn(eval_fn(embed + noise), state)
    embed_perturbed = embed + noise
    state_perturbed = jnp.dot(embed_perturbed.astype(w.dtype), w,
                              preferred_element_type=jnp.float32)
    diff = state_perturbed - state
    partial = jnp.sum(diff * diff) * inv_nc

    i = pl.program_id(0)

    @pl.when(i == 0)
    def _init():
        acc_ref[0, 0] = 0.0

    acc_ref[0, 0] += partial

    @pl.when(i == pl.num_programs(0) - 1)
    def _finalize():
        out_ref[0, 0] = acc_ref[0, 0]


def smart_loss(embed, state, w, noise, *, tile_rows=None):
    """embed: (N,H), state: (N,C), w: (H,C), noise: (N,H) ~ N(0,1). Returns scalar."""
    N, H = embed.shape
    Hw, C = w.shape
    assert Hw == H and state.shape == (N, C) and noise.shape == (N, H)

    # Lane-dense zero padding (exact no-op for the math, see header comment).
    Hp = _round_up(H, 128)
    Cp = _round_up(C, 128)

    if tile_rows is None:
        # Small demo -> TM=8 (exercises the multi-step accumulator); real N ->
        # 256 rows.  TODO(synk): bump toward 512-1024 on v5e/v6e (128 MiB VMEM);
        # keep ~256 on v7x (32 MiB default scoped VMEM).
        tile_rows = 256 if N >= 256 else 8
    tm = max(8, min(tile_rows, _round_up(N, 8)))
    Np = _round_up(N, tm)

    embed_p = jnp.pad(embed, ((0, Np - N), (0, Hp - H)))
    noise_p = jnp.pad(noise, ((0, Np - N), (0, Hp - H)))
    state_p = jnp.pad(state, ((0, Np - N), (0, Cp - C)))
    w_p = jnp.pad(w, ((0, Hp - H), (0, Cp - C)))

    kernel = functools.partial(
        smart_loss_kernel,
        num_steps=NUM_STEPS, step_size=STEP_SIZE, epsilon=EPSILON,
        noise_var=NOISE_VAR, inv_nc=1.0 / float(N * C))

    itemsize = jnp.dtype(embed.dtype).itemsize
    flops = 2 * Np * Hp * Cp * (2 * NUM_STEPS + 1) + 6 * Np * Hp * NUM_STEPS
    bytes_accessed = itemsize * (2 * Np * Hp + Np * Cp + Hp * Cp) + 4

    out = pl.pallas_call(
        kernel,
        out_shape=jax.ShapeDtypeStruct((1, 1), jnp.float32),
        grid=(Np // tm,),
        in_specs=[
            pl.BlockSpec((tm, Hp), lambda i: (i, 0)),   # embed  (row-pipelined)
            pl.BlockSpec((tm, Cp), lambda i: (i, 0)),   # state  (row-pipelined)
            pl.BlockSpec((Hp, Cp), lambda i: (0, 0)),   # W      (resident)
            pl.BlockSpec((tm, Hp), lambda i: (i, 0)),   # noise  (row-pipelined)
        ],
        out_specs=pl.BlockSpec(memory_space=pltpu.MemorySpace.SMEM),
        scratch_shapes=[pltpu.SMEM((1, 1), jnp.float32)],
        compiler_params=pltpu.CompilerParams(
            dimension_semantics=("arbitrary",)),
        cost_estimate=pl.CostEstimate(
            flops=flops, transcendentals=0, bytes_accessed=bytes_accessed),
    )(embed_p, state_p, w_p, noise_p)
    return out[0, 0]


def smart_loss_ref(embed, state, w, noise):
    """Pure-JAX reference using autodiff (mirrors the PyTorch forward)."""
    eval_fn = lambda x: x @ w
    loss_fn = lambda a, b: jnp.mean((a - b) ** 2)
    nz = noise * NOISE_VAR
    for _ in range(NUM_STEPS):
        g = jax.grad(lambda n: loss_fn(eval_fn(embed + n), state))(nz)
        step = nz + STEP_SIZE * g
        step_norm = jnp.max(jnp.abs(step), axis=-1, keepdims=True)
        nz = step / (step_norm + EPSILON)
    return loss_fn(eval_fn(embed + nz), state)


if __name__ == "__main__":
    # Small deterministic shapes: batch=2, seq=8 -> N=16 rows, hidden=32, classes=8.
    # With TM=8 the grid has 2 steps, exercising the tiled accumulator path.
    N, H, C = 16, 32, 8
    key = jax.random.PRNGKey(0)
    k_e, k_s, k_w, k_n = jax.random.split(key, 4)

    embed = jax.random.normal(k_e, (N, H), dtype=jnp.float32)
    w = jax.random.normal(k_w, (H, C), dtype=jnp.float32) * 0.1  # "params"
    state = embed @ w + 0.05 * jax.random.normal(k_s, (N, C), dtype=jnp.float32)
    noise = jax.random.normal(k_n, (N, H), dtype=jnp.float32)    # randn_like(embed)

    out = jax.block_until_ready(smart_loss(embed, state, w, noise))
    ref = jax.block_until_ready(smart_loss_ref(embed, state, w, noise))

    assert jnp.allclose(out, ref, rtol=1e-5, atol=1e-6), (out, ref)
    print("KERNEL_OK")
</pallas_src>

<mosaic_0001>
module attributes {stable_mosaic.version = 11 : i64} {
  func.func @smart_loss_kernel(%arg0: i32, %arg1: memref<8x128xf32, #tpu.memory_space<vmem>>, %arg2: memref<8x128xf32, #tpu.memory_space<vmem>>, %arg3: memref<128x128xf32, #tpu.memory_space<vmem>>, %arg4: memref<8x128xf32, #tpu.memory_space<vmem>>, %arg5: memref<1x1xf32, #tpu.memory_space<smem>>, %arg6: memref<1x1xf32, #tpu.memory_space<smem>>) attributes {dimension_semantics = [#tpu.dimension_semantics<arbitrary>], iteration_bounds = array<i64: 2>, scalar_prefetch = 0 : i64, scratch_operands = 1 : i64, tpu.core_type = #tpu.core_type<tc>, window_params = [{transform_indices = @transform_0, window_bounds = array<i64: 8, 128>}, {transform_indices = @transform_1, window_bounds = array<i64: 8, 128>}, {pipeline_mode = #tpu.pipeline_mode<synchronous>, transform_indices = @transform_2, window_bounds = array<i64: 128, 128>}, {transform_indices = @transform_3, window_bounds = array<i64: 8, 128>}, {transform_indices = @transform_4, window_bounds = array<i64: 1, 1>}]} {
    %c0 = arith.constant 0 : index
    %c0_0 = arith.constant 0 : index
    %0 = vector.load %arg3[%c0, %c0_0] : memref<128x128xf32, #tpu.memory_space<vmem>>, vector<128x128xf32>
    %c0_1 = arith.constant 0 : index
    %c0_2 = arith.constant 0 : index
    %1 = vector.load %arg1[%c0_1, %c0_2] : memref<8x128xf32, #tpu.memory_space<vmem>>, vector<8x128xf32>
    %c0_3 = arith.constant 0 : index
    %c0_4 = arith.constant 0 : index
    %2 = vector.load %arg2[%c0_3, %c0_4] : memref<8x128xf32, #tpu.memory_space<vmem>>, vector<8x128xf32>
    %c0_5 = arith.constant 0 : index
    %c0_6 = arith.constant 0 : index
    %3 = vector.load %arg4[%c0_5, %c0_6] : memref<8x128xf32, #tpu.memory_space<vmem>>, vector<8x128xf32>
    %cst = arith.constant 9.99999974E-6 : f32
    %4 = vector.broadcast %cst : f32 to vector<8x128xf32>
    %5 = arith.mulf %3, %4 : vector<8x128xf32>
    %6 = arith.addf %1, %5 : vector<8x128xf32>
    %cst_7 = arith.constant dense<0.000000e+00> : vector<8x128xf32>
    %7 = tpu.matmul %6, %0, %cst_7 {dimension_numbers = #tpu.dot_dimension_numbers<[1], [0], [0], [1], [0, 0, 1, 1], [], []>} : vector<8x128xf32>, vector<128x128xf32>, vector<8x128xf32> -> vector<8x128xf32>
    %8 = arith.subf %7, %2 : vector<8x128xf32>
    %cst_8 = arith.constant dense<0.000000e+00> : vector<8x128xf32>
    %9 = tpu.matmul %8, %0, %cst_8 {dimension_numbers = #tpu.dot_dimension_numbers<[1], [1], [0], [0], [0, 0, 1, 0], [], []>} : vector<8x128xf32>, vector<128x128xf32>, vector<8x128xf32> -> vector<8x128xf32>
    %cst_9 = arith.constant 1.562500e-02 : f32
    %10 = vector.broadcast %cst_9 : f32 to vector<8x128xf32>
    %11 = arith.mulf %10, %9 : vector<8x128xf32>
    %cst_10 = arith.constant 1.000000e-03 : f32
    %12 = vector.broadcast %cst_10 : f32 to vector<8x128xf32>
    %13 = arith.mulf %12, %11 : vector<8x128xf32>
    %14 = arith.addf %5, %13 : vector<8x128xf32>
    %15 = math.absf %14 : vector<8x128xf32>
    %cst_11 = arith.constant dense<0xFF800000> : vector<8xf32>
    %16 = vector.multi_reduction <maximumf>, %15, %cst_11 [1] : vector<8x128xf32> to vector<8xf32>
    %17 = vector.shape_cast %16 : vector<8xf32> to vector<8x1xf32>
    %cst_12 = arith.constant 9.99999997E-7 : f32
    %18 = vector.broadcast %cst_12 : f32 to vector<8x1xf32>
    %19 = arith.addf %17, %18 : vector<8x1xf32>
    %20 = tpu.reciprocal %19 : vector<8x1xf32> -> vector<8x1xf32>
    %21 = vector.broadcast %20 : vector<8x1xf32> to vector<8x128xf32>
    %22 = arith.mulf %14, %21 : vector<8x128xf32>
    %23 = arith.addf %1, %22 : vector<8x128xf32>
    %cst_13 = arith.constant dense<0.000000e+00> : vector<8x128xf32>
    %24 = tpu.matmul %23, %0, %cst_13 {dimension_numbers = #tpu.dot_dimension_numbers<[1], [0], [0], [1], [0, 0, 1, 1], [], []>} : vector<8x128xf32>, vector<128x128xf32>, vector<8x128xf32> -> vector<8x128xf32>
    %25 = arith.subf %24, %2 : vector<8x128xf32>
    %26 = arith.mulf %25, %25 : vector<8x128xf32>
    %27 = vector.shape_cast %26 : vector<8x128xf32> to vector<1x8x128xf32>
    %cst_14 = arith.constant dense<0.000000e+00> : vector<1xf32>
    %28 = vector.multi_reduction <add>, %27, %cst_14 [1, 2] : vector<1x8x128xf32> to vector<1xf32>
    %29 = vector.shape_cast %28 : vector<1xf32> to vector<1x1x1xf32>
    %30 = vector.extract %29[0, 0, 0] : f32 from vector<1x1x1xf32>
    %cst_15 = arith.constant 7.812500e-03 : f32
    %31 = arith.mulf %30, %cst_15 : f32
    %c0_i32 = arith.constant 0 : i32
    %32 = arith.cmpi eq, %arg0, %c0_i32 : i32
    %33 = arith.extui %32 : i1 to i32
    %c0_i32_16 = arith.constant 0 : i32
    %34 = arith.cmpi ne, %33, %c0_i32_16 : i32
    scf.if %34 {
      %cst_22 = arith.constant 0.000000e+00 : f32
      %c0_23 = arith.constant 0 : index
      %c0_24 = arith.constant 0 : index
      %41 = memref.load %arg6[%c0_23, %c0_24] : memref<1x1xf32, #tpu.memory_space<smem>>
      memref.store %cst_22, %arg6[%c0_23, %c0_24] : memref<1x1xf32, #tpu.memory_space<smem>>
    } else {
    }
    %c0_17 = arith.constant 0 : index
    %c0_18 = arith.constant 0 : index
    %35 = memref.load %arg6[%c0_17, %c0_18] : memref<1x1xf32, #tpu.memory_space<smem>>
    %36 = arith.addf %35, %31 : f32
    %c0_19 = arith.constant 0 : index
    %c0_20 = arith.constant 0 : index
    %37 = memref.load %arg6[%c0_19, %c0_20] : memref<1x1xf32, #tpu.memory_space<smem>>
    memref.store %36, %arg6[%c0_19, %c0_20] : memref<1x1xf32, #tpu.memory_space<smem>>
    %c1_i32 = arith.constant 1 : i32
    %38 = arith.cmpi eq, %arg0, %c1_i32 : i32
    %39 = arith.extui %38 : i1 to i32
    %c0_i32_21 = arith.constant 0 : i32
    %40 = arith.cmpi ne, %39, %c0_i32_21 : i32
    scf.if %40 {
      %c0_22 = arith.constant 0 : index
      %c0_23 = arith.constant 0 : index
      %41 = memref.load %arg6[%c0_22, %c0_23] : memref<1x1xf32, #tpu.memory_space<smem>>
      %c0_24 = arith.constant 0 : index
      %c0_25 = arith.constant 0 : index
      %42 = memref.load %arg5[%c0_24, %c0_25] : memref<1x1xf32, #tpu.memory_space<smem>>
      memref.store %41, %arg5[%c0_24, %c0_25] : memref<1x1xf32, #tpu.memory_space<smem>>
    } else {
    }
    return
  }
  func.func @transform_0(%arg0: i32) -> (i32, i32) {
    %c0_i32 = arith.constant 0 : i32
    %c0_i32_0 = arith.constant 0 : i32
    return %arg0, %c0_i32 : i32, i32
  }
  func.func @transform_1(%arg0: i32) -> (i32, i32) {
    %c0_i32 = arith.constant 0 : i32
    %c0_i32_0 = arith.constant 0 : i32
    return %arg0, %c0_i32 : i32, i32
  }
  func.func @transform_2(%arg0: i32) -> (i32, i32) {
    %c0_i32 = arith.constant 0 : i32
    %c0_i32_0 = arith.constant 0 : i32
    %c0_i32_1 = arith.constant 0 : i32
    return %c0_i32, %c0_i32_0 : i32, i32
  }
  func.func @transform_3(%arg0: i32) -> (i32, i32) {
    %c0_i32 = arith.constant 0 : i32
    %c0_i32_0 = arith.constant 0 : i32
    return %arg0, %c0_i32 : i32, i32
  }
  func.func @transform_4(%arg0: i32) -> (i32, i32) {
    %c0_i32 = arith.constant 0 : i32
    %c0_i32_0 = arith.constant 0 : i32
    %c0_i32_1 = arith.constant 0 : i32
    return %c0_i32, %c0_i32_0 : i32, i32
  }
}

</mosaic_0001>

<bundles_post_ra>
// kernel: tpu_custom_call.1
= control target key start
LH: loop header
LB: loop body
LE: loop exit
PB: predicated region body
PF: predicated region fallthrough
CT: control target
= control target key end

     0   :  { %9 = vsyncpa [#allocation4], 0  ;;  %s1491_s0 = inlined_call_operand.hbm [shape: f32[16,128], index: 0, kind: input, shape index: {}]   ;;  %s1492_s1 = inlined_call_operand.hbm [shape: f32[16,128], index: 1, kind: input, shape index: {}]   ;;  %s1493_s2 = inlined_call_operand.hbm [shape: f32[128,128], index: 2, kind: input, shape index: {}]   ;;  %s1494_s3 = inlined_call_operand.hbm [shape: f32[16,128], index: 3, kind: input, shape index: {}]   ;;  %s1495_s4 = inlined_call_operand.hbm [shape: f32[1,1], index: 4, kind: output, shape index: {}]  }
   0x1   :  { %11 = vsyncpa [#allocation4 + $0x1], 0 }
   0x2   :  { %12 = vsyncpa [#allocation7], 0 }
   0x3   :  { %14 = vsyncpa [#allocation7 + $0x1], 0 }
   0x4   :  { %15 = vsyncpa [#allocation10], 0 }
   0x5   :  { %17 = vsyncpa [#allocation10 + $0x1], 0 }
   0x6   :  { %18 = vsyncpa [#allocation5], 0  ;;  %s1221_s15 = smov 0   ;;  %s1223_s16 = smov 0  }
   0x7   :  { %s1225_s17 = smov 0   ;;  %s1227_s18 = smov 0  }
   0x8 LB: > { %s1240_s19 = sadd.s32 4294967295, %s1183_s18   ;;  %p44_p0 = scmp.ne.s32.totalorder %s1175_s16, %s1171_s15  ;;  %s1183_s18 = sphi %s1227_s18, %s1516_s18   ;;  %s1179_s17 = sphi %s1225_s17, %s1515_s17   ;;  %s1175_s16 = sphi %s1223_s16, %s1514_s16   ;;  %s1171_s15 = sphi %s1221_s15, %s1513_s15  }
   0x9   : > { %p1496_p1 = scmp.eq.s32.totalorder %s1240_s19, 0  ;;  %p672_p2 = scmp.ge.s32.totalorder %s1183_s18, 1 }
   0xa   : > { %p149_p3 = scmp.lt.s32.totalorder %s1183_s18, 3  ;;  %s1185_s22 = smov [#allocation8]  }
   0xb   : > { %p1248_p4 = por %p1496_p1, %p44_p0  ;;  %s161_s23 = sshll.u32 %s1185_s22, 4  ;;  %s162_s23 = int_to_ptr.vmem [resolvable:$true] %s161_s23 }
   0xc   : > { %p1252_p5 = pnand %p672_p2, %p149_p3  ;;  %s1265_s25 = sadd.s32 1, %s1183_s18  }
   0xd   : > { %s1501_s20 = scalar_select %p1248_p4, 1, 0 }
   0xe   : > { %s1502_s21 = scalar_select %p1252_p5, 1, 0 }
   0xf   : > { %p940_p6 = pneg %p1252_p5  ;;  %s31_s26 = sadd.s32 1, %s1179_s17 }
  0x10   : > { %s28_s27 = ssub.s32 %s1183_s18, %s1265_s25  ;;  %s1003_s30 = scalar_lea.hbm %s1493_s2, 2048 }
  0x11   : > { %p1260_p7 = pnand %p940_p6, %p1496_p1  ;;  %p1004_p8 = scmp.ne.s32.totalorder %s1493_s2, %s1003_s30 }
  0x12   : > { %p1010_p12 = scmp.lt.u32.totalorder %s1003_s30, %s1493_s2 }
  0x13   : > { %p1005_p9 = pneg %p1260_p7 }
  0x15   : > { %p1006_p10 = pnand %p1005_p9, %p1004_p8 }
  0x17   : > { %p1007_p11 = pneg %p1006_p10 }
  0x19   : > { %p1012_p13 = pnand %p1010_p12, %p1007_p11 }
  0x1b   : > { %1015 = shalt.err (!%p1012_p13)
}
  0x1c   : > { %s1016_s9 = scalar_lea.vmem %s162_s23, 2048  ;;  %p1024_p6 = scmp.lt.s32.totalorder %s162_s23, %s162_s23 }
  0x1d   : > { %p1017_p0 = scmp.ne.s32.totalorder %s162_s23, %s1016_s9  ;;  %p1025_p1 = scmp.lt.s32.totalorder %s1016_s9, %s1016_s9 }
  0x1f   : > { %p1019_p2 = pnand %p1017_p0, %p1005_p9  ;;  %p1026_p4 = por %p1025_p1, %p1024_p6 }
  0x21   : > { %p1020_p3 = pneg %p1019_p2 }
  0x23   : > { %p1027_p5 = pnand %p1026_p4, %p1020_p3 }
  0x25   : > { %1030 = shalt.err (!%p1027_p5)
}
  0x26   : > { %s1186_s10 = smov 128   ;;  %s1187_s11 = smov 8  }
  0x27   : > { %943 = dma.hbm_to_vmem [thread:$0]  (!%p1260_p7), %s1493_s2, 2048, %s162_s23, [#allocation7], %s1186_s10, %s1186_s10, %s1187_s11  }
  0x28   : > { %p29_p8 = scmp.eq.s32.totalorder %s28_s27, 0  ;;  %p38_p1 = scmp.ne.s32.totalorder %s1179_s17, %s1175_s16 }
  0x29   : > { %p39_p4 = scmp.eq.s32.totalorder %s1183_s18, 0  ;;  %p955_p5 = scmp.lt.s32.totalorder %s1183_s18, 2 }
  0x2a   : > { %s1291_s14 = scalar_select %p29_p8, %s1179_s17, %s31_s26  }
  0x2b   : > { %p40_p9 = por %p39_p4, %p38_p1  ;;  %s1294_s15 = sand.u32 1, %s1179_s17  }
  0x2c   : > { %s1297_s22 = sshll.u32 %s1294_s15, 3  ;;  %s1300_s24 = sshll.u32 %s1183_s18, 7 }
  0x2d   : > { %s1306_s23 = scalar_lea.hbm %s1491_s0, %s1300_s24  ;;  %s179_s26 = scalar_lea.vmem [#allocation3], %s1297_s22 }
  0x2e   : > { %s186_s27 = sshll.u32 %s179_s26, 4  ;;  %p1311_p7 = pnand %p955_p5, %p40_p9  ;;  %s1309_s27 = int_to_ptr.vmem [resolvable:$true] %s186_s27 }
  0x2f   : > { %s193_s5 = sand.u32 1, %s1183_s18   ;;  %s176_s6 = scalar_lea.sflag [#allocation4], %s1294_s15 }
  0x30   : > { %s1504_s30 = scalar_select %p1311_p7, 1, 0 }
  0x31   : > { %s1031_s7 = scalar_lea.hbm %s1306_s23, 128  ;;  %p1321_p11 = pneg %p1311_p7 }
  0x32   : > { %p1032_p10 = scmp.ne.s32.totalorder %s1306_s23, %s1031_s7  ;;  %s1036_s11 = scalar_lea.hbm %s1491_s0, 256 }
  0x33   : > { %p1037_p0 = scmp.lt.u32.totalorder %s1306_s23, %s1491_s0  ;;  %p1038_p2 = scmp.lt.u32.totalorder %s1036_s11, %s1031_s7 }
  0x34   : > { %p1034_p12 = pnand %p1321_p11, %p1032_p10  ;;  %p1040_p6 = scmp.lt.u32.totalorder %s1031_s7, %s1306_s23 }
  0x35   : > { %p1039_p3 = por %p1038_p2, %p1037_p0 }
  0x36   : > { %p1035_p13 = pneg %p1034_p12 }
  0x37   : > { %p1041_p8 = por %p1040_p6, %p1039_p3 }
  0x39   : > { %p1042_p1 = pnand %p1041_p8, %p1035_p13 }
  0x3b   : > { %1045 = shalt.err (!%p1042_p1)
}
  0x3c   : > { %s1046_s28 = scalar_lea.vmem %s1309_s27, 128  ;;  %s1188_s29 = smov [#allocation3]  }
  0x3d   : > { %p1047_p4 = scmp.ne.s32.totalorder %s1309_s27, %s1046_s28  ;;  %s1051_s26 = sshll.u32 %s1188_s29, 4  ;;  %s1052_s26 = int_to_ptr.vmem [resolvable:$false] %s1051_s26 }
  0x3e   : > { %s1053_s9 = scalar_lea.vmem %s1052_s26, 256  ;;  %p1054_p10 = scmp.lt.s32.totalorder %s1309_s27, %s1052_s26 }
  0x3f   : > { %p1049_p5 = pnand %p1047_p4, %p1321_p11  ;;  %p1055_p12 = scmp.lt.s32.totalorder %s1053_s9, %s1046_s28 }
  0x41   : > { %p1050_p9 = pneg %p1049_p5  ;;  %p1056_p0 = por %p1055_p12, %p1054_p10 }
  0x43   : > { %p1057_p2 = pnand %p1056_p0, %p1050_p9 }
  0x45   : > { %1060 = shalt.err (!%p1057_p2)
}
  0x46   : > { %947 = dma.hbm_to_vmem [thread:$0]  (!%p1311_p7), %s1306_s23, 128, %s1309_s27, %s176_s6  }
  0x47   : > { %s1348_s11 = scalar_lea.hbm %s1492_s1, %s1300_s24  ;;  %s197_s12 = scalar_lea.vmem [#allocation6], %s1297_s22 }
  0x48   : > { %s204_s13 = sshll.u32 %s197_s12, 4  ;;  %s194_s28 = scalar_lea.sflag [#allocation7], %s193_s5  ;;  %s205_s13 = int_to_ptr.vmem [resolvable:$true] %s204_s13 }
  0x49   : > { %s1061_s29 = scalar_lea.hbm %s1348_s11, 128  ;;  %s1066_s6 = scalar_lea.hbm %s1492_s1, 256 }
  0x4a   : > { %p1062_p13 = scmp.ne.s32.totalorder %s1348_s11, %s1061_s29  ;;  %p1067_p8 = scmp.lt.u32.totalorder %s1348_s11, %s1492_s1 }
  0x4b   : > { %p1068_p1 = scmp.lt.u32.totalorder %s1066_s6, %s1061_s29  ;;  %p1070_p5 = scmp.lt.u32.totalorder %s1061_s29, %s1348_s11 }
  0x4c   : > { %p1064_p3 = pnand %p1062_p13, %p1321_p11 }
  0x4d   : > { %p1069_p4 = por %p1068_p1, %p1067_p8 }
  0x4e   : > { %p1065_p6 = pneg %p1064_p3 }
  0x4f   : > { %p1071_p9 = por %p1070_p5, %p1069_p4 }
  0x51   : > { %p1072_p10 = pnand %p1071_p9, %p1065_p6 }
  0x53   : > { %1075 = shalt.err (!%p1072_p10)
}
  0x54   : > { %s1076_s18 = scalar_lea.vmem %s205_s13, 128  ;;  %s1189_s5 = smov [#allocation6]  }
  0x55   : > { %p1077_p12 = scmp.ne.s32.totalorder %s205_s13, %s1076_s18  ;;  %s1081_s7 = sshll.u32 %s1189_s5, 4  ;;  %s1082_s7 = int_to_ptr.vmem [resolvable:$false] %s1081_s7 }
  0x56   : > { %s1083_s10 = scalar_lea.vmem %s1082_s7, 256  ;;  %p1084_p13 = scmp.lt.s32.totalorder %s205_s13, %s1082_s7 }
  0x57   : > { %p1079_p0 = pnand %p1077_p12, %p1321_p11  ;;  %p1085_p3 = scmp.lt.s32.totalorder %s1083_s10, %s1076_s18 }
  0x59   : > { %p1080_p2 = pneg %p1079_p0  ;;  %p1086_p7 = por %p1085_p3, %p1084_p13 }
  0x5b   : > { %p1087_p1 = pnand %p1086_p7, %p1080_p2 }
  0x5d   : > { %1090 = shalt.err (!%p1087_p1)
}
  0x5e   : > { %p1506_p8 = scmp.ne.s32.totalorder %s1504_s30, 0  ;;  %s1374_s23 = scalar_lea.hbm %s1494_s3, %s1300_s24 }
  0x5f   : > { %s215_s27 = scalar_lea.vmem [#allocation9], %s1297_s22  ;;  %s212_s26 = scalar_lea.sflag [#allocation10], %s1294_s15 }
  0x60   : > { %950 = dma.hbm_to_vmem [thread:$0]  (!%p1506_p8), %s1348_s11, 128, %s205_s13, %s194_s28  }
  0x61   : > { %s222_s6 = sshll.u32 %s215_s27, 4  ;;  %s1091_s9 = scalar_lea.hbm %s1374_s23, 128  ;;  %s223_s6 = int_to_ptr.vmem [resolvable:$true] %s222_s6 }
  0x62   : > { %p1092_p7 = scmp.ne.s32.totalorder %s1374_s23, %s1091_s9  ;;  %s1096_s13 = scalar_lea.hbm %s1494_s3, 256 }
  0x63   : > { %p1097_p5 = scmp.lt.u32.totalorder %s1374_s23, %s1494_s3  ;;  %p1098_p9 = scmp.lt.u32.totalorder %s1096_s13, %s1091_s9 }
  0x64   : > { %p1094_p6 = pnand %p1092_p7, %p1321_p11  ;;  %p1100_p12 = scmp.lt.u32.totalorder %s1091_s9, %s1374_s23 }
  0x65   : > { %p1099_p10 = por %p1098_p9, %p1097_p5 }
  0x66   : > { %p1095_p4 = pneg %p1094_p6 }
  0x67   : > { %p1101_p0 = por %p1100_p12, %p1099_p10 }
  0x69   : > { %p1102_p2 = pnand %p1101_p0, %p1095_p4 }
  0x6b   : > { %1105 = shalt.err (!%p1102_p2)
}
  0x6c   : > { %s1106_s15 = scalar_lea.vmem %s223_s6, 128  ;;  %s1190_s22 = smov [#allocation9]  }
  0x6d   : > { %p1107_p13 = scmp.ne.s32.totalorder %s223_s6, %s1106_s15  ;;  %s1111_s5 = sshll.u32 %s1190_s22, 4  ;;  %s1112_s5 = int_to_ptr.vmem [resolvable:$false] %s1111_s5 }
  0x6e   : > { %s1113_s7 = scalar_lea.vmem %s1112_s5, 256  ;;  %p1114_p7 = scmp.lt.s32.totalorder %s223_s6, %s1112_s5 }
  0x6f   : > { %p1109_p3 = pnand %p1107_p13, %p1321_p11  ;;  %p1115_p6 = scmp.lt.s32.totalorder %s1113_s7, %s1106_s15 }
  0x71   : > { %p1110_p1 = pneg %p1109_p3  ;;  %p1116_p8 = por %p1115_p6, %p1114_p7 }
  0x73   : > { %p1117_p5 = pnand %p1116_p8, %p1110_p1 }
  0x75   : > { %1120 = shalt.err (!%p1117_p5)
}
  0x76   : > { %p1507_p9 = scmp.ne.s32.totalorder %s1504_s30, 0  ;;  %p1508_p4 = scmp.ne.s32.totalorder %s1502_s21, 0 }
  0x77   : > { %s233_s8 = sand.u32 (!%p1508_p4), 1, %s1175_s16   ;;  %p1509_p11 = scmp.ne.s32.totalorder (!%p1508_p4), %s1501_s20, 0 }
  0x78   : > { %953 = dma.hbm_to_vmem [thread:$0]  (!%p1507_p9), %s1374_s23, 128, %s223_s6, %s212_s26  }
  0x79   : > { %231 = sbr.rel (%p1508_p4) target bundleno = 1197 (0x4ad), region = 36  ;;  %s1398_s10 = sshll.u32 (!%p1508_p4), %s233_s8, 3 }
  0x7a   : > { %s234_s12 = scalar_lea.sflag (!%p1508_p4), [#allocation4], %s233_s8  ;;  %s237_s29 = scalar_lea.vmem (!%p1508_p4), [#allocation3], %s1398_s10 }
  0x80   : > { %1150 = dma.done.wait (%p1509_p11), %s234_s12, 128  }
  0x81   : > { %1152 = vsyncadd (%p1509_p11), %s234_s12, 4294967168  ;;  %s242_s30 = sand.u32 1, %s1240_s19   ;;  %s246_s21 = scalar_lea.vmem [#allocation6], %s1398_s10 }
  0x82   : > { %s243_s23 = scalar_lea.sflag [#allocation7], %s242_s30 }
  0x83   : > { %1154 = dma.done.wait (%p1509_p11), %s243_s23, 128  }
  0x84   : > { %1156 = vsyncadd (%p1509_p11), %s243_s23, 4294967168  ;;  %p1510_p8 = scmp.eq.s32.totalorder %s1240_s19, 0 }
  0x86   : > { %1158 = dma.done.wait (%p1510_p8), [#allocation7], 2048   ;;  %p1511_p10 = pmov %p1510_p8 }
  0x87   : > { %s256_s27 = scalar_lea.sflag [#allocation10], %s233_s8  ;;  %s259_s6 = scalar_lea.vmem [#allocation9], %s1398_s10 }
  0x88   : > { %1160 = vsyncadd (%p1511_p10), [#allocation7], 4294965248 }
  0x89   : > { %1162 = dma.done.wait (%p1509_p11), %s256_s27, 128  }
  0x8a   : > { %1164 = vsyncadd (%p1509_p11), %s256_s27, 4294967168  ;;  %v1191_v0 = vmov 0.0|0.0   ;;  %vm1192_vm0 = vmmov 0   ;;  %v1193_v1 = vmov 0.0   ;;  %v289_v2 = vld [vmem:[#allocation8] sm:$0xff]  ;;  %v290_v3 = vld [vmem:[#allocation8 + $0x8] sm:$0xff]  ;;  %p1512_p12 = pmov %p1510_p8 }
  0x8b   : > { %848 = vmatprep.subr.bf16.mxu0 %v1191_v0  ;;  %775 = vmatprep.mubr.msk.f32.mxu0 %vm1192_vm0, %v1193_v1  ;;  %v291_v4 = vld [vmem:[#allocation8 + $0x10] sm:$0xff]  ;;  %v849_v5 = vpack.c.bf16 %v290_v3, %v289_v2  ;;  %v292_v6 = vld [vmem:[#allocation8 + $0x18] sm:$0xff]  ;;  %v293_v8 = vld [vmem:[#allocation8 + $0x20] sm:$0xff]  ;;  %s1194_s20 = smov 0.0   ;;  %p958_p0 = scmp.eq.s32.totalorder %s1240_s19, 1 }
  0x8c   : > { %872 = vmatprep.subr.bf16.mxu1 %v1191_v0  ;;  %810 = vmatprep.mubr.msk.f32.mxu1 %vm1192_vm0, %v1193_v1  ;;  %v852_v7 = vpack.c.bf16 %v292_v6, %v291_v4  ;;  %v294_v9 = vld [vmem:[#allocation8 + $0x28] sm:$0xff]  ;;  %v295_v11 = vld [vmem:[#allocation8 + $0x30] sm:$0xff]  ;;  %v296_v12 = vld [vmem:[#allocation8 + $0x38] sm:$0xff]  ;;  %933 = sst [smem:[#allocation2]] (%p1512_p12), %s1194_s20  ;;  %s1121_s24 = scalar_lea.hbm %s1495_s4, 16 }
  0x8d   : > { %850 = vmatpush3.bf16.msra.mxu0 %v849_v5  ;;  %874 = vmatpush3.bf16.xpose.msra.mxu1 %v849_v5  ;;  %v855_v10 = vpack.c.bf16 %v294_v9, %v293_v8  ;;  %v858_v13 = vpack.c.bf16 %v296_v12, %v295_v11  ;;  %v297_v14 = vld [vmem:[#allocation8 + $0x40] sm:$0xff]  ;;  %v298_v15 = vld [vmem:[#allocation8 + $0x48] sm:$0xff]  ;;  %v299_v17 = vld [vmem:[#allocation8 + $0x50] sm:$0xff]  ;;  %s549_s26 = sld [smem:[#allocation2]]  ;;  %p1122_p2 = scmp.ne.s32.totalorder %s1495_s4, %s1121_s24 }
  0x8e   : > { %851 = vmatprep.subr.bf16.mxu0 %v1191_v0  ;;  %875 = vmatprep.subr.bf16.mxu1 %v1191_v0  ;;  %v861_v16 = vpack.c.bf16 %v298_v15, %v297_v14  ;;  %v300_v18 = vld [vmem:[#allocation8 + $0x58] sm:$0xff]  ;;  %v301_v20 = vld [vmem:[#allocation8 + $0x60] sm:$0xff]  ;;  %v302_v21 = vld [vmem:[#allocation8 + $0x68] sm:$0xff]  ;;  %p1127_p1 = scmp.lt.u32.totalorder %s1121_s24, %s1495_s4 }
  0x8f   : > { %v864_v19 = vpack.c.bf16 %v300_v18, %v299_v17  ;;  %v867_v22 = vpack.c.bf16 %v302_v21, %v301_v20  ;;  %v307_v23 = vld [vmem:[%s259_s6] sm:$0xff]  ;;  %v303_v24 = vld [vmem:[#allocation8 + $0x70] sm:$0xff]  ;;  %v304_v25 = vld [vmem:[#allocation8 + $0x78] sm:$0xff]  ;;  %p1123_p13 = pnand %p1122_p2, %p958_p0 }
  0x90   : > { %v308_v26 = vmul.f32 1e-05, %v307_v23  ;;  %v870_v27 = vpack.c.bf16 %v304_v25, %v303_v24  ;;  %v305_v28 = vld [vmem:[%s237_s29] sm:$0xff]  ;;  %v306_v30 = vld [vmem:[%s246_s21] sm:$0xff] }
  0x91   : > { %853 = vmatpush3.bf16.msra.mxu0 %v852_v7  ;;  %p1124_p3 = pneg %p1123_p13 }
  0x92   : > { %854 = vmatprep.subr.bf16.mxu0 %v1191_v0  ;;  %v309_v29 = vadd.f32 %v308_v26, %v305_v28 }
  0x93   : > { %p1129_p7 = pnand %p1127_p1, %p1124_p3 }
  0x95   : > { %856 = vmatpush3.bf16.msra.mxu0 %v855_v10  ;;  %877 = vmatpush3.bf16.xpose.msra.mxu1 %v852_v7 }
  0x96   : > { %857 = vmatprep.subr.bf16.mxu0 %v1191_v0  ;;  %878 = vmatprep.subr.bf16.mxu1 %v1191_v0 }
  0x99   : > { %859 = vmatpush3.bf16.msra.mxu0 %v858_v13 }
  0x9a   : > { %860 = vmatprep.subr.bf16.mxu0 %v1191_v0 }
  0x9d   : > { %862 = vmatpush3.bf16.msra.mxu0 %v861_v16  ;;  %880 = vmatpush3.bf16.xpose.msra.mxu1 %v855_v10 }
  0x9e   : > { %863 = vmatprep.subr.bf16.mxu0 %v1191_v0  ;;  %881 = vmatprep.subr.bf16.mxu1 %v1191_v0 }
  0xa1   : > { %865 = vmatpush3.bf16.msra.mxu0 %v864_v19 }
  0xa2   : > { %866 = vmatprep.subr.bf16.mxu0 %v1191_v0 }
  0xa5   : > { %868 = vmatpush3.bf16.msra.mxu0 %v867_v22  ;;  %883 = vmatpush3.bf16.xpose.msra.mxu1 %v858_v13 }
  0xa6   : > { %869 = vmatprep.subr.bf16.mxu0 %v1191_v0  ;;  %884 = vmatprep.subr.bf16.mxu1 %v1191_v0 }
  0xa9   : > { %871 = vmatpush3.bf16.msra.mxu0 %v870_v27 }
  0xaa   : > { %896 = vmatprep.subr.bf16.mxu0 %v1191_v0 }
  0xac   : > { %776 = vmatmul.mubr.f32.vlgmr.msra.gmra.mrb[0].mxu0 %v309_v29 }
  0xad   : > { %886 = vmatpush3.bf16.xpose.msra.mxu1 %v861_v16  ;;  %898 = vmatpush3.bf16.msra.mxu0 %v849_v5 }
  0xae   : > { %887 = vmatprep.subr.bf16.mxu1 %v1191_v0  ;;  %899 = vmatprep.subr.bf16.mxu0 %v1191_v0 }
  0xaf   : > { %845 = vmatprep.mubr.msk.f32.mxu0 %vm1192_vm0, %v1193_v1 }
  0xb1   : > { %901 = vmatpush3.bf16.msra.mxu0 %v852_v7 }
  0xb2   : > { %902 = vmatprep.subr.bf16.mxu0 %v1191_v0 }
  0xb5   : > { %889 = vmatpush3.bf16.xpose.msra.mxu1 %v864_v19  ;;  %904 = vmatpush3.bf16.msra.mxu0 %v855_v10 }
  0xb6   : > { %890 = vmatprep.subr.bf16.mxu1 %v1191_v0  ;;  %905 = vmatprep.subr.bf16.mxu0 %v1191_v0 }
  0xb9   : > { %907 = vmatpush3.bf16.msra.mxu0 %v858_v13 }
  0xba   : > { %908 = vmatprep.subr.bf16.mxu0 %v1191_v0 }
  0xbd   : > { %892 = vmatpush3.bf16.xpose.msra.mxu1 %v867_v22  ;;  %910 = vmatpush3.bf16.msra.mxu0 %v861_v16 }
  0xbe   : > { %893 = vmatprep.subr.bf16.mxu1 %v1191_v0  ;;  %911 = vmatprep.subr.bf16.mxu0 %v1191_v0 }
  0xc1   : > { %913 = vmatpush3.bf16.msra.mxu0 %v864_v19 }
  0xc2   : > { %914 = vmatprep.subr.bf16.mxu0 %v1191_v0 }
  0xc5   : > { %895 = vmatpush3.bf16.xpose.msra.mxu1 %v870_v27  ;;  %916 = vmatpush3.bf16.msra.mxu0 %v867_v22 }
  0xc6   : > { %917 = vmatprep.subr.bf16.mxu0 %v1191_v0 }
  0xc9   : > { %919 = vmatpush3.bf16.msra.mxu0 %v870_v27 }
 0x17f   : > { %v376_v31 = vpop.f32.mrb[0].mxu0 }
 0x180   : > { %v380_v32 = vsub.f32 %v376_v31, %v306_v30  ;;  %v777_v33 = vpop.f32.mrb[1].mxu0 }
 0x182   : > { %811 = vmatmul.mubr.f32.vlgmr.msra.gmra.mrb[0].mxu1 %v380_v32 }
 0x255   : > { %v447_v34 = vpop.f32.mrb[0].mxu1 }
 0x256   : > { %v451_v35 = vmul.f32 0.015625, %v447_v34  ;;  %v812_v36 = vpop.f32.mrb[1].mxu1 }
 0x258   : > { %v452_v37 = vmul.f32 0.001, %v451_v35 }
 0x25a   : > { %v453_v38 = vadd.f32 %v452_v37, %v308_v26 }
 0x25c   : > { %v454_v39 = vand.u32 2147483647, %v453_v38 }
 0x25e   : > { %455 = vmax.xlane.f32.xlu0 %v454_v39 }
 0x2eb   : > { %v456_v40 = vpop.xlane.xlu0 %455 }
 0x2ec   : > { %v457_v41 = vadd.f32 1e-06, %v456_v40 }
 0x2ee   : > { %1001 = vrcp.f32 %v457_v41 }
 0x2f8   : > { %v1002_v42 = vpop.eup %1001 }
 0x2f9   : > { %v459_v43 = vmul.f32 %v1002_v42, %v453_v38 }
 0x2fb   : > { %v460_v44 = vadd.f32 %v459_v43, %v305_v28 }
 0x2fd   : > { %846 = vmatmul.mubr.f32.vlgmr.msra.gmra.mrb[2].mxu0 %v460_v44 }
 0x3d0   : > { %v527_v45 = vpop.f32.mrb[2].mxu0 }
 0x3d1   : > { %v531_v46 = vsub.f32 %v527_v45, %v306_v30  ;;  %v847_v47 = vpop.f32.mrb[3].mxu0 }
 0x3d3   : > { %v532_v48 = vmul.f32 %v531_v46, %v531_v46 }
 0x3d5   : > { %533 = vadd.xlane.f32.xlu0 %v532_v48 }
 0x462   : > { %v534_v49 = vpop.xlane.xlu0 %533 }
 0x463   : > { %v535_v50 = vrot.slane %v534_v49, 4 }
 0x465   : > { %v536_v51 = vadd.f32 %v535_v50, %v534_v49 }
 0x467   : > { %v537_v52 = vrot.slane %v536_v51, 2 }
 0x469   : > { %v538_v53 = vadd.f32 %v537_v52, %v536_v51 }
 0x46b   : > { %v539_v54 = vrot.slane %v538_v53, 1 }
 0x46d   : > { %v540_v55 = vadd.f32 %v539_v54, %v538_v53 }
 0x46f   : > { %920 = vpush %v540_v55 }
 0x4a0   : > { %s921_s9 = spop %920 }
 0x4a1   : > { %s542_s18 = smul.f32 0.0078125, %s921_s9 }
 0x4a3   : > { %s550_s11 = sadd.f32 %s549_s26, %s542_s18 }
 0x4a5   : > { %552 = sst [smem:[#allocation2]] %s550_s11 }
 0x4a6   : > { %935 = sst [smem:[#allocation11]] (%p958_p0), %s550_s11 }
 0x4a7   : > { %1132 = shalt.err (!%p1129_p7)
}
 0x4a8   : > { %s1195_s8 = smov [#allocation11]  }
 0x4a9   : > { %937 = dma.smem_to_hbm (%p958_p0), %s1195_s8, 16, %s1495_s4, [#allocation5]  }
 0x4aa   : > { %1166 = dma.done.wait (%p958_p0), [#allocation5], 16  }
 0x4ab   : > { %1168 = vsyncadd (%p958_p0), [#allocation5], 4294967280 }
 0x4ac   : > { %573 = sfence }
 0x4ad PF: > { %p21_p6 = scmp.ge.s32.totalorder %s1265_s25, 4   ;;  %s1513_s15 = smov %s1175_s16 }
 0x4ae   : > { %s1514_s16 = smov %s1179_s17  ;;  %s1515_s17 = smov %s1291_s14 }
 0x4af   : > { %s1516_s18 = smov %s1265_s25  ;;  %23 = sbr.rel (!%p21_p6) target bundleno = 8 (0x8), region = 114 }
 0x4b6   :  { %579 = vsyncpa [#allocation4], 1 }
 0x4b7   :  { %581 = vsyncpa [#allocation4 + $0x1], 1 }
 0x4b8   :  { %582 = vsyncpa [#allocation7], 1 }
 0x4b9   :  { %584 = vsyncpa [#allocation7 + $0x1], 1 }
 0x4ba   :  { %585 = vsyncpa [#allocation10], 1 }
 0x4bb   :  { %587 = vsyncpa [#allocation10 + $0x1], 1 }
 0x4bc   :  { %588 = vsyncpa [#allocation5], 1 }
 0x4bd   :  { %590 = vsyncpa [#allocation5 + $0x1], 1 }

</bundles_post_ra>
